<compile_context>
chip_gen: v6e
topology: v6e:2x2x1
jax: 0.10.0
libtpu: 0.0.40
codegen_flags: <defaults>
</compile_context>

<pallas_src>
import math
import functools

import jax
import jax.numpy as jnp
from jax import lax
from jax.experimental import pallas as pl
from jax.experimental.pallas import tpu as pltpu

EMBED_DIM = 64
NUM_HEADS = 4
HEAD_DIM = EMBED_DIM // NUM_HEADS


def _pick_batch_block(B: int, S: int) -> int:
    """Batch elements per grid step.

    Aim for >= ~256 rows per step (fills the MXU M dim, amortizes the per-step
    grid overhead) while keeping
      * B % BB == 0,
      * the lane-dense output block legal: BB == B or (BB * EMBED_DIM) % 128 == 0.
    """
    target_rows = 256
    if B * S <= 2 * target_rows:
        return B                      # whole batch in a single grid step
    bb = max(2, ((target_rows + S - 1) // S) // 2 * 2)   # even -> BB*64 % 128 == 0
    bb = min(bb, B)
    while bb > 1 and (B % bb != 0 or (bb * EMBED_DIM) % 128 != 0):
        bb -= 1
    return bb if (bb > 1 and B % bb == 0) else B


def _make_mha_kernel(BB: int, S: int, return_weights: bool):
    E, H, D = EMBED_DIM, NUM_HEADS, HEAD_DIM
    M = BB * S

    def kernel(q_ref, k_ref, v_ref, wf_ref, bf_ref, wo_ref, bo_ref, out_ref, *rest):
        ctx_ref = rest[-1]                                # VMEM scratch (M, E)
        attn_ref = rest[0] if return_weights else None

        # ---- fused Q/K/V projection: one MXU pass ------------------------------
        # Row-stack the three (M, E) operands -> (3M, E); single dot against the
        # fused (E, 3E) weight (Q block pre-scaled by 1/sqrt(D) in the wrapper).
        x_rows = jnp.concatenate([q_ref[...], k_ref[...], v_ref[...]], axis=0)
        proj = jnp.dot(x_rows, wf_ref[...],
                       preferred_element_type=jnp.float32)            # (3M, 3E)

        q_all = proj[0 * M:1 * M, 0 * E:1 * E] + bf_ref[:, 0 * E:1 * E]  # (M, E), scaled
        k_all = proj[1 * M:2 * M, 1 * E:2 * E] + bf_ref[:, 1 * E:2 * E]  # (M, E)
        v_all = proj[2 * M:3 * M, 2 * E:3 * E] + bf_ref[:, 2 * E:3 * E]  # (M, E)

        # contract last dims of both operands: 'sd,td->st' (no explicit transpose)
        dn = (((1,), (1,)), ((), ()))

        # ---- per-(batch, head) attention: static lane slices, fully unrolled ----
        for b in range(BB):
            r0 = b * S
            for h in range(H):
                c0 = h * D
                q_bh = q_all[r0:r0 + S, c0:c0 + D]                     # (S, D)
                k_bh = k_all[r0:r0 + S, c0:c0 + D]                     # (S, D)
                v_bh = v_all[r0:r0 + S, c0:c0 + D]                     # (S, D)

                s_bh = lax.dot_general(q_bh, k_bh, dn,
                                       preferred_element_type=jnp.float32)  # (S, S)
                m_bh = jnp.max(s_bh, axis=-1, keepdims=True)
                p_bh = jnp.exp(s_bh - m_bh)
                den = jnp.sum(p_bh, axis=-1, keepdims=True)
                w_bh = p_bh * pl.reciprocal(den, approx=False)          # (S, S)

                if return_weights:
                    attn_ref[b, h] = w_bh
                ctx_ref[r0:r0 + S, c0:c0 + D] = jnp.dot(
                    w_bh, v_bh, preferred_element_type=jnp.float32)     # (S, D)

        # ---- output projection over all BB*S rows at once ------------------------
        out = jnp.dot(ctx_ref[...], wo_ref[...],
                      preferred_element_type=jnp.float32) + bo_ref[...]  # (M, E)

        # Lane-dense store: out_ref is (S, BB*E); column group b holds batch b.
        for b in range(BB):
            out_ref[:, b * E:(b + 1) * E] = out[b * S:(b + 1) * S, :]

    return kernel


@functools.partial(jax.jit, static_argnames=("return_weights",))
def multi_head_attention(query, key, value, params, return_weights=True):
    """query/key/value: (B, S, E) float32.  Returns (output, attention_weights)
    like the PyTorch module, or just `output` when return_weights=False."""
    B, S, E = query.shape
    assert E == EMBED_DIM
    H, D = NUM_HEADS, HEAD_DIM

    # ---- wrapper-side layout plumbing / weight fusion (tiny XLA ops) -------------
    scale = 1.0 / math.sqrt(D)        # 0.25 here -> folding into W_q is exact
    wf = jnp.concatenate([params["wq_t"] * scale, params["wk_t"], params["wv_t"]],
                         axis=1)                                       # (E, 3E)
    bf = jnp.concatenate([params["bq"] * scale, params["bk"], params["bv"]],
                         axis=1)                                       # (1, 3E)
    wo, bo = params["wo_t"], params["bo"]

    q2 = query.reshape(B * S, E)
    k2 = key.reshape(B * S, E)
    v2 = value.reshape(B * S, E)

    BB = _pick_batch_block(B, S)
    nb = B // BB
    # NOTE(v7x): with 2 TensorCores, prefer nb >= 2 "parallel" grid steps once the
    # problem is large enough to split; at these tiny shapes one step is cheaper.
    kernel = _make_mha_kernel(BB, S, return_weights)

    x_spec = pl.BlockSpec((BB * S, E), lambda i: (i, 0))
    rep = lambda i: (0, 0)
    in_specs = [x_spec, x_spec, x_spec,
                pl.BlockSpec((E, 3 * E), rep),
                pl.BlockSpec((1, 3 * E), rep),
                pl.BlockSpec((E, E), rep),
                pl.BlockSpec((1, E), rep)]

    # Lane-dense main output: (S, B*E); attention weights keep their natural 4-D
    # layout (tiny, and optional via return_weights=False).
    out_shape = [jax.ShapeDtypeStruct((S, B * E), jnp.float32)]
    out_specs = [pl.BlockSpec((S, BB * E), lambda i: (0, i))]
    if return_weights:
        out_shape.append(jax.ShapeDtypeStruct((B, H, S, S), jnp.float32))
        out_specs.append(pl.BlockSpec((BB, H, S, S), lambda i: (i, 0, 0, 0)))

    flops = int(2 * (3 * B * S) * E * (3 * E)          # fused QKV projection
                + 2 * B * H * S * S * D * 2            # scores + context matmuls
                + 2 * B * S * E * E)                   # output projection
    bytes_accessed = int(4 * (3 * B * S * E + B * S * E
                              + (B * H * S * S if return_weights else 0)
                              + E * 3 * E + 3 * E + E * E + E))
    cost = pl.CostEstimate(flops=flops,
                           transcendentals=int(B * H * S * S),
                           bytes_accessed=bytes_accessed)

    fn = pl.pallas_call(
        kernel,
        out_shape=tuple(out_shape),
        grid_spec=pltpu.PrefetchScalarGridSpec(
            num_scalar_prefetch=0,
            grid=(nb,),
            in_specs=in_specs,
            out_specs=tuple(out_specs),
            scratch_shapes=[pltpu.VMEM((BB * S, E), jnp.float32)],
        ),
        compiler_params=pltpu.CompilerParams(
            dimension_semantics=("parallel",)),
        cost_estimate=cost,
    )
    res = fn(q2, k2, v2, wf, bf, wo, bo)

    out = res[0].reshape(S, B, E).transpose(1, 0, 2)               # (B, S, E)
    if return_weights:
        return out, res[1]
    return out


def _init_params(key):
    """Deterministic synthetic parameters (PyTorch Linear stores W as (out, in);
    we pre-transpose so the math is x @ W_t + b)."""
    ks = jax.random.split(key, 8)

    def lin(kw, kb):
        w = jax.random.normal(kw, (EMBED_DIM, EMBED_DIM), jnp.float32) * 0.05
        b = jax.random.normal(kb, (1, EMBED_DIM), jnp.float32) * 0.05
        return w.T, b

    wq_t, bq = lin(ks[0], ks[1])
    wk_t, bk = lin(ks[2], ks[3])
    wv_t, bv = lin(ks[4], ks[5])
    wo_t, bo = lin(ks[6], ks[7])
    return dict(wq_t=wq_t, bq=bq, wk_t=wk_t, bk=bk,
                wv_t=wv_t, bv=bv, wo_t=wo_t, bo=bo)


def _reference(query, key, value, p):
    """Pure-JAX reference mirroring the PyTorch forward."""
    B, S, E = query.shape
    H, D = NUM_HEADS, HEAD_DIM
    Q = (query @ p["wq_t"] + p["bq"]).reshape(B, S, H, D).transpose(0, 2, 1, 3)
    K = (key   @ p["wk_t"] + p["bk"]).reshape(B, S, H, D).transpose(0, 2, 1, 3)
    V = (value @ p["wv_t"] + p["bv"]).reshape(B, S, H, D).transpose(0, 2, 1, 3)
    scores = jnp.einsum('bhsd,bhtd->bhst', Q, K) / jnp.sqrt(jnp.float32(D))
    w = jax.nn.softmax(scores, axis=-1)
    ctx = jnp.einsum('bhst,bhtd->bhsd', w, V).transpose(0, 2, 1, 3).reshape(B, S, E)
    out = ctx @ p["wo_t"] + p["bo"]
    return out, w


if __name__ == "__main__":
    key = jax.random.PRNGKey(0)
    k_p, k_q, k_k, k_v = jax.random.split(key, 4)

    B, S = 2, 8
    params = _init_params(k_p)
    query = jax.random.normal(k_q, (B, S, EMBED_DIM), jnp.float32)
    key_in = jax.random.normal(k_k, (B, S, EMBED_DIM), jnp.float32)
    value = jax.random.normal(k_v, (B, S, EMBED_DIM), jnp.float32)

    out, attn = multi_head_attention(query, key_in, value, params)
    out = jax.block_until_ready(out)
    attn = jax.block_until_ready(attn)

    ref_out, ref_attn = _reference(query, key_in, value, params)
    assert out.shape == (B, S, EMBED_DIM)
    assert attn.shape == (B, NUM_HEADS, S, S)
    assert jnp.allclose(out, ref_out, atol=1e-4, rtol=1e-4)
    assert jnp.allclose(attn, ref_attn, atol=1e-4, rtol=1e-4)

    # need_weights=False variant: skips the attention-weights HBM write entirely.
    out_only = jax.block_until_ready(
        multi_head_attention(query, key_in, value, params, return_weights=False))
    assert jnp.allclose(out_only, out, atol=1e-5, rtol=1e-5)

    print("KERNEL_OK")
</pallas_src>

<mosaic_0001>
module attributes {stable_mosaic.version = 11 : i64} {
  func.func @kernel(%arg0: i32, %arg1: memref<16x64xf32, #tpu.memory_space<vmem>>, %arg2: memref<16x64xf32, #tpu.memory_space<vmem>>, %arg3: memref<16x64xf32, #tpu.memory_space<vmem>>, %arg4: memref<64x192xf32, #tpu.memory_space<vmem>>, %arg5: memref<1x192xf32, #tpu.memory_space<vmem>>, %arg6: memref<64x64xf32, #tpu.memory_space<vmem>>, %arg7: memref<1x64xf32, #tpu.memory_space<vmem>>, %arg8: memref<8x128xf32, #tpu.memory_space<vmem>>, %arg9: memref<2x4x8x8xf32, #tpu.memory_space<vmem>>, %arg10: memref<16x64xf32, #tpu.memory_space<vmem>>) attributes {dimension_semantics = [#tpu.dimension_semantics<parallel>], iteration_bounds = array<i64: 1>, scalar_prefetch = 0 : i64, scratch_operands = 1 : i64, tpu.core_type = #tpu.core_type<tc>, window_params = [{transform_indices = @transform_0, window_bounds = array<i64: 16, 64>}, {transform_indices = @transform_1, window_bounds = array<i64: 16, 64>}, {transform_indices = @transform_2, window_bounds = array<i64: 16, 64>}, {pipeline_mode = #tpu.pipeline_mode<synchronous>, transform_indices = @transform_3, window_bounds = array<i64: 64, 192>}, {pipeline_mode = #tpu.pipeline_mode<synchronous>, transform_indices = @transform_4, window_bounds = array<i64: 1, 192>}, {pipeline_mode = #tpu.pipeline_mode<synchronous>, transform_indices = @transform_5, window_bounds = array<i64: 64, 64>}, {pipeline_mode = #tpu.pipeline_mode<synchronous>, transform_indices = @transform_6, window_bounds = array<i64: 1, 64>}, {transform_indices = @transform_7, window_bounds = array<i64: 8, 128>}, {transform_indices = @transform_8, window_bounds = array<i64: 2, 4, 8, 8>}]} {
    %c0 = arith.constant 0 : index
    %c0_0 = arith.constant 0 : index
    %0 = vector.load %arg1[%c0, %c0_0] : memref<16x64xf32, #tpu.memory_space<vmem>>, vector<16x64xf32>
    %c0_1 = arith.constant 0 : index
    %c0_2 = arith.constant 0 : index
    %1 = vector.load %arg2[%c0_1, %c0_2] : memref<16x64xf32, #tpu.memory_space<vmem>>, vector<16x64xf32>
    %c0_3 = arith.constant 0 : index
    %c0_4 = arith.constant 0 : index
    %2 = vector.load %arg3[%c0_3, %c0_4] : memref<16x64xf32, #tpu.memory_space<vmem>>, vector<16x64xf32>
    %3 = tpu.concatenate %0, %1, %2 in 0 : vector<16x64xf32>, vector<16x64xf32>, vector<16x64xf32> -> vector<48x64xf32>
    %c0_5 = arith.constant 0 : index
    %c0_6 = arith.constant 0 : index
    %4 = vector.load %arg4[%c0_5, %c0_6] : memref<64x192xf32, #tpu.memory_space<vmem>>, vector<64x192xf32>
    %cst = arith.constant dense<0.000000e+00> : vector<48x192xf32>
    %5 = tpu.matmul %3, %4, %cst {dimension_numbers = #tpu.dot_dimension_numbers<[1], [0], [0], [1], [0, 0, 1, 1], [], []>} : vector<48x64xf32>, vector<64x192xf32>, vector<48x192xf32> -> vector<48x192xf32>
    %6 = vector.extract_strided_slice %5 {offsets = [0, 0], sizes = [16, 64], strides = [1, 1]} : vector<48x192xf32> to vector<16x64xf32>
    %c0_7 = arith.constant 0 : index
    %c0_8 = arith.constant 0 : index
    %7 = vector.load %arg5[%c0_7, %c0_8] : memref<1x192xf32, #tpu.memory_space<vmem>>, vector<1x64xf32>
    %8 = vector.broadcast %7 : vector<1x64xf32> to vector<16x64xf32>
    %9 = arith.addf %6, %8 : vector<16x64xf32>
    %10 = vector.extract_strided_slice %5 {offsets = [16, 64], sizes = [16, 64], strides = [1, 1]} : vector<48x192xf32> to vector<16x64xf32>
    %c0_9 = arith.constant 0 : index
    %c64 = arith.constant 64 : index
    %11 = vector.load %arg5[%c0_9, %c64] : memref<1x192xf32, #tpu.memory_space<vmem>>, vector<1x64xf32>
    %12 = vector.broadcast %11 : vector<1x64xf32> to vector<16x64xf32>
    %13 = arith.addf %10, %12 : vector<16x64xf32>
    %14 = vector.extract_strided_slice %5 {offsets = [32, 128], sizes = [16, 64], strides = [1, 1]} : vector<48x192xf32> to vector<16x64xf32>
    %c0_10 = arith.constant 0 : index
    %c128 = arith.constant 128 : index
    %15 = vector.load %arg5[%c0_10, %c128] : memref<1x192xf32, #tpu.memory_space<vmem>>, vector<1x64xf32>
    %16 = vector.broadcast %15 : vector<1x64xf32> to vector<16x64xf32>
    %17 = arith.addf %14, %16 : vector<16x64xf32>
    %18 = vector.extract_strided_slice %9 {offsets = [0, 0], sizes = [8, 16], strides = [1, 1]} : vector<16x64xf32> to vector<8x16xf32>
    %19 = vector.extract_strided_slice %13 {offsets = [0, 0], sizes = [8, 16], strides = [1, 1]} : vector<16x64xf32> to vector<8x16xf32>
    %20 = vector.extract_strided_slice %17 {offsets = [0, 0], sizes = [8, 16], strides = [1, 1]} : vector<16x64xf32> to vector<8x16xf32>
    %cst_11 = arith.constant dense<0.000000e+00> : vector<8x8xf32>
    %21 = tpu.matmul %18, %19, %cst_11 {dimension_numbers = #tpu.dot_dimension_numbers<[1], [1], [0], [0], [0, 0, 1, 0], [], []>} : vector<8x16xf32>, vector<8x16xf32>, vector<8x8xf32> -> vector<8x8xf32>
    %cst_12 = arith.constant dense<0xFF800000> : vector<8xf32>
    %22 = vector.multi_reduction <maximumf>, %21, %cst_12 [1] : vector<8x8xf32> to vector<8xf32>
    %23 = vector.shape_cast %22 : vector<8xf32> to vector<8x1xf32>
    %24 = vector.broadcast %23 : vector<8x1xf32> to vector<8x8xf32>
    %25 = arith.subf %21, %24 : vector<8x8xf32>
    %26 = math.exp %25 : vector<8x8xf32>
    %cst_13 = arith.constant dense<0.000000e+00> : vector<8xf32>
    %27 = vector.multi_reduction <add>, %26, %cst_13 [1] : vector<8x8xf32> to vector<8xf32>
    %28 = vector.shape_cast %27 : vector<8xf32> to vector<8x1xf32>
    %29 = tpu.reciprocal %28 : vector<8x1xf32> -> vector<8x1xf32>
    %30 = vector.broadcast %29 : vector<8x1xf32> to vector<8x8xf32>
    %31 = arith.mulf %26, %30 : vector<8x8xf32>
    %c0_14 = arith.constant 0 : index
    %c0_15 = arith.constant 0 : index
    %c0_16 = arith.constant 0 : index
    %c0_17 = arith.constant 0 : index
    %32 = vector.load %arg9[%c0_14, %c0_15, %c0_16, %c0_17] : memref<2x4x8x8xf32, #tpu.memory_space<vmem>>, vector<1x1x8x8xf32>
    %33 = vector.shape_cast %32 : vector<1x1x8x8xf32> to vector<8x8xf32>
    %34 = vector.shape_cast %31 : vector<8x8xf32> to vector<1x1x8x8xf32>
    tpu.vector_store %arg9[%c0_14, %c0_15, %c0_16, %c0_17], %34 {strides = array<i32>} : memref<2x4x8x8xf32, #tpu.memory_space<vmem>>, vector<1x1x8x8xf32>,
    %cst_18 = arith.constant dense<0.000000e+00> : vector<8x16xf32>
    %35 = tpu.matmul %31, %20, %cst_18 {dimension_numbers = #tpu.dot_dimension_numbers<[1], [0], [0], [1], [0, 0, 1, 1], [], []>} : vector<8x8xf32>, vector<8x16xf32>, vector<8x16xf32> -> vector<8x16xf32>
    %c0_19 = arith.constant 0 : index
    %c0_20 = arith.constant 0 : index
    %36 = vector.load %arg10[%c0_19, %c0_20] : memref<16x64xf32, #tpu.memory_space<vmem>>, vector<8x16xf32>
    tpu.vector_store %arg10[%c0_19, %c0_20], %35 {strides = array<i32>} : memref<16x64xf32, #tpu.memory_space<vmem>>, vector<8x16xf32>,
    %37 = vector.extract_strided_slice %9 {offsets = [0, 16], sizes = [8, 16], strides = [1, 1]} : vector<16x64xf32> to vector<8x16xf32>
    %38 = vector.extract_strided_slice %13 {offsets = [0, 16], sizes = [8, 16], strides = [1, 1]} : vector<16x64xf32> to vector<8x16xf32>
    %39 = vector.extract_strided_slice %17 {offsets = [0, 16], sizes = [8, 16], strides = [1, 1]} : vector<16x64xf32> to vector<8x16xf32>
    %cst_21 = arith.constant dense<0.000000e+00> : vector<8x8xf32>
    %40 = tpu.matmul %37, %38, %cst_21 {dimension_numbers = #tpu.dot_dimension_numbers<[1], [1], [0], [0], [0, 0, 1, 0], [], []>} : vector<8x16xf32>, vector<8x16xf32>, vector<8x8xf32> -> vector<8x8xf32>
    %cst_22 = arith.constant dense<0xFF800000> : vector<8xf32>
    %41 = vector.multi_reduction <maximumf>, %40, %cst_22 [1] : vector<8x8xf32> to vector<8xf32>
    %42 = vector.shape_cast %41 : vector<8xf32> to vector<8x1xf32>
    %43 = vector.broadcast %42 : vector<8x1xf32> to vector<8x8xf32>
    %44 = arith.subf %40, %43 : vector<8x8xf32>
    %45 = math.exp %44 : vector<8x8xf32>
    %cst_23 = arith.constant dense<0.000000e+00> : vector<8xf32>
    %46 = vector.multi_reduction <add>, %45, %cst_23 [1] : vector<8x8xf32> to vector<8xf32>
    %47 = vector.shape_cast %46 : vector<8xf32> to vector<8x1xf32>
    %48 = tpu.reciprocal %47 : vector<8x1xf32> -> vector<8x1xf32>
    %49 = vector.broadcast %48 : vector<8x1xf32> to vector<8x8xf32>
    %50 = arith.mulf %45, %49 : vector<8x8xf32>
    %c0_24 = arith.constant 0 : index
    %c1 = arith.constant 1 : index
    %c0_25 = arith.constant 0 : index
    %c0_26 = arith.constant 0 : index
    %51 = vector.load %arg9[%c0_24, %c1, %c0_25, %c0_26] : memref<2x4x8x8xf32, #tpu.memory_space<vmem>>, vector<1x1x8x8xf32>
    %52 = vector.shape_cast %51 : vector<1x1x8x8xf32> to vector<8x8xf32>
    %53 = vector.shape_cast %50 : vector<8x8xf32> to vector<1x1x8x8xf32>
    tpu.vector_store %arg9[%c0_24, %c1, %c0_25, %c0_26], %53 {strides = array<i32>} : memref<2x4x8x8xf32, #tpu.memory_space<vmem>>, vector<1x1x8x8xf32>,
    %cst_27 = arith.constant dense<0.000000e+00> : vector<8x16xf32>
    %54 = tpu.matmul %50, %39, %cst_27 {dimension_numbers = #tpu.dot_dimension_numbers<[1], [0], [0], [1], [0, 0, 1, 1], [], []>} : vector<8x8xf32>, vector<8x16xf32>, vector<8x16xf32> -> vector<8x16xf32>
    %c0_28 = arith.constant 0 : index
    %c16 = arith.constant 16 : index
    %55 = vector.load %arg10[%c0_28, %c16] : memref<16x64xf32, #tpu.memory_space<vmem>>, vector<8x16xf32>
    tpu.vector_store %arg10[%c0_28, %c16], %54 {strides = array<i32>} : memref<16x64xf32, #tpu.memory_space<vmem>>, vector<8x16xf32>,
    %56 = vector.extract_strided_slice %9 {offsets = [0, 32], sizes = [8, 16], strides = [1, 1]} : vector<16x64xf32> to vector<8x16xf32>
    %57 = vector.extract_strided_slice %13 {offsets = [0, 32], sizes = [8, 16], strides = [1, 1]} : vector<16x64xf32> to vector<8x16xf32>
    %58 = vector.extract_strided_slice %17 {offsets = [0, 32], sizes = [8, 16], strides = [1, 1]} : vector<16x64xf32> to vector<8x16xf32>
    %cst_29 = arith.constant dense<0.000000e+00> : vector<8x8xf32>
    %59 = tpu.matmul %56, %57, %cst_29 {dimension_numbers = #tpu.dot_dimension_numbers<[1], [1], [0], [0], [0, 0, 1, 0], [], []>} : vector<8x16xf32>, vector<8x16xf32>, vector<8x8xf32> -> vector<8x8xf32>
    %cst_30 = arith.constant dense<0xFF800000> : vector<8xf32>
    %60 = vector.multi_reduction <maximumf>, %59, %cst_30 [1] : vector<8x8xf32> to vector<8xf32>
    %61 = vector.shape_cast %60 : vector<8xf32> to vector<8x1xf32>
    %62 = vector.broadcast %61 : vector<8x1xf32> to vector<8x8xf32>
    %63 = arith.subf %59, %62 : vector<8x8xf32>
    %64 = math.exp %63 : vector<8x8xf32>
    %cst_31 = arith.constant dense<0.000000e+00> : vector<8xf32>
    %65 = vector.multi_reduction <add>, %64, %cst_31 [1] : vector<8x8xf32> to vector<8xf32>
    %66 = vector.shape_cast %65 : vector<8xf32> to vector<8x1xf32>
    %67 = tpu.reciprocal %66 : vector<8x1xf32> -> vector<8x1xf32>
    %68 = vector.broadcast %67 : vector<8x1xf32> to vector<8x8xf32>
    %69 = arith.mulf %64, %68 : vector<8x8xf32>
    %c0_32 = arith.constant 0 : index
    %c2 = arith.constant 2 : index
    %c0_33 = arith.constant 0 : index
    %c0_34 = arith.constant 0 : index
    %70 = vector.load %arg9[%c0_32, %c2, %c0_33, %c0_34] : memref<2x4x8x8xf32, #tpu.memory_space<vmem>>, vector<1x1x8x8xf32>
    %71 = vector.shape_cast %70 : vector<1x1x8x8xf32> to vector<8x8xf32>
    %72 = vector.shape_cast %69 : vector<8x8xf32> to vector<1x1x8x8xf32>
    tpu.vector_store %arg9[%c0_32, %c2, %c0_33, %c0_34], %72 {strides = array<i32>} : memref<2x4x8x8xf32, #tpu.memory_space<vmem>>, vector<1x1x8x8xf32>,
    %cst_35 = arith.constant dense<0.000000e+00> : vector<8x16xf32>
    %73 = tpu.matmul %69, %58, %cst_35 {dimension_numbers = #tpu.dot_dimension_numbers<[1], [0], [0], [1], [0, 0, 1, 1], [], []>} : vector<8x8xf32>, vector<8x16xf32>, vector<8x16xf32> -> vector<8x16xf32>
    %c0_36 = arith.constant 0 : index
    %c32 = arith.constant 32 : index
    %74 = vector.load %arg10[%c0_36, %c32] : memref<16x64xf32, #tpu.memory_space<vmem>>, vector<8x16xf32>
    tpu.vector_store %arg10[%c0_36, %c32], %73 {strides = array<i32>} : memref<16x64xf32, #tpu.memory_space<vmem>>, vector<8x16xf32>,
    %75 = vector.extract_strided_slice %9 {offsets = [0, 48], sizes = [8, 16], strides = [1, 1]} : vector<16x64xf32> to vector<8x16xf32>
    %76 = vector.extract_strided_slice %13 {offsets = [0, 48], sizes = [8, 16], strides = [1, 1]} : vector<16x64xf32> to vector<8x16xf32>
    %77 = vector.extract_strided_slice %17 {offsets = [0, 48], sizes = [8, 16], strides = [1, 1]} : vector<16x64xf32> to vector<8x16xf32>
    %cst_37 = arith.constant dense<0.000000e+00> : vector<8x8xf32>
    %78 = tpu.matmul %75, %76, %cst_37 {dimension_numbers = #tpu.dot_dimension_numbers<[1], [1], [0], [0], [0, 0, 1, 0], [], []>} : vector<8x16xf32>, vector<8x16xf32>, vector<8x8xf32> -> vector<8x8xf32>
    %cst_38 = arith.constant dense<0xFF800000> : vector<8xf32>
    %79 = vector.multi_reduction <maximumf>, %78, %cst_38 [1] : vector<8x8xf32> to vector<8xf32>
    %80 = vector.shape_cast %79 : vector<8xf32> to vector<8x1xf32>
    %81 = vector.broadcast %80 : vector<8x1xf32> to vector<8x8xf32>
    %82 = arith.subf %78, %81 : vector<8x8xf32>
    %83 = math.exp %82 : vector<8x8xf32>
    %cst_39 = arith.constant dense<0.000000e+00> : vector<8xf32>
    %84 = vector.multi_reduction <add>, %83, %cst_39 [1] : vector<8x8xf32> to vector<8xf32>
    %85 = vector.shape_cast %84 : vector<8xf32> to vector<8x1xf32>
    %86 = tpu.reciprocal %85 : vector<8x1xf32> -> vector<8x1xf32>
    %87 = vector.broadcast %86 : vector<8x1xf32> to vector<8x8xf32>
    %88 = arith.mulf %83, %87 : vector<8x8xf32>
    %c0_40 = arith.constant 0 : index
    %c3 = arith.constant 3 : index
    %c0_41 = arith.constant 0 : index
    %c0_42 = arith.constant 0 : index
    %89 = vector.load %arg9[%c0_40, %c3, %c0_41, %c0_42] : memref<2x4x8x8xf32, #tpu.memory_space<vmem>>, vector<1x1x8x8xf32>
    %90 = vector.shape_cast %89 : vector<1x1x8x8xf32> to vector<8x8xf32>
    %91 = vector.shape_cast %88 : vector<8x8xf32> to vector<1x1x8x8xf32>
    tpu.vector_store %arg9[%c0_40, %c3, %c0_41, %c0_42], %91 {strides = array<i32>} : memref<2x4x8x8xf32, #tpu.memory_space<vmem>>, vector<1x1x8x8xf32>,
    %cst_43 = arith.constant dense<0.000000e+00> : vector<8x16xf32>
    %92 = tpu.matmul %88, %77, %cst_43 {dimension_numbers = #tpu.dot_dimension_numbers<[1], [0], [0], [1], [0, 0, 1, 1], [], []>} : vector<8x8xf32>, vector<8x16xf32>, vector<8x16xf32> -> vector<8x16xf32>
    %c0_44 = arith.constant 0 : index
    %c48 = arith.constant 48 : index
    %93 = vector.load %arg10[%c0_44, %c48] : memref<16x64xf32, #tpu.memory_space<vmem>>, vector<8x16xf32>
    tpu.vector_store %arg10[%c0_44, %c48], %92 {strides = array<i32>} : memref<16x64xf32, #tpu.memory_space<vmem>>, vector<8x16xf32>,
    %94 = vector.extract_strided_slice %9 {offsets = [8, 0], sizes = [8, 16], strides = [1, 1]} : vector<16x64xf32> to vector<8x16xf32>
    %95 = vector.extract_strided_slice %13 {offsets = [8, 0], sizes = [8, 16], strides = [1, 1]} : vector<16x64xf32> to vector<8x16xf32>
    %96 = vector.extract_strided_slice %17 {offsets = [8, 0], sizes = [8, 16], strides = [1, 1]} : vector<16x64xf32> to vector<8x16xf32>
    %cst_45 = arith.constant dense<0.000000e+00> : vector<8x8xf32>
    %97 = tpu.matmul %94, %95, %cst_45 {dimension_numbers = #tpu.dot_dimension_numbers<[1], [1], [0], [0], [0, 0, 1, 0], [], []>} : vector<8x16xf32>, vector<8x16xf32>, vector<8x8xf32> -> vector<8x8xf32>
    %cst_46 = arith.constant dense<0xFF800000> : vector<8xf32>
    %98 = vector.multi_reduction <maximumf>, %97, %cst_46 [1] : vector<8x8xf32> to vector<8xf32>
    %99 = vector.shape_cast %98 : vector<8xf32> to vector<8x1xf32>
    %100 = vector.broadcast %99 : vector<8x1xf32> to vector<8x8xf32>
    %101 = arith.subf %97, %100 : vector<8x8xf32>
    %102 = math.exp %101 : vector<8x8xf32>
    %cst_47 = arith.constant dense<0.000000e+00> : vector<8xf32>
    %103 = vector.multi_reduction <add>, %102, %cst_47 [1] : vector<8x8xf32> to vector<8xf32>
    %104 = vector.shape_cast %103 : vector<8xf32> to vector<8x1xf32>
    %105 = tpu.reciprocal %104 : vector<8x1xf32> -> vector<8x1xf32>
    %106 = vector.broadcast %105 : vector<8x1xf32> to vector<8x8xf32>
    %107 = arith.mulf %102, %106 : vector<8x8xf32>
    %c1_48 = arith.constant 1 : index
    %c0_49 = arith.constant 0 : index
    %c0_50 = arith.constant 0 : index
    %c0_51 = arith.constant 0 : index
    %108 = vector.load %arg9[%c1_48, %c0_49, %c0_50, %c0_51] : memref<2x4x8x8xf32, #tpu.memory_space<vmem>>, vector<1x1x8x8xf32>
    %109 = vector.shape_cast %108 : vector<1x1x8x8xf32> to vector<8x8xf32>
    %110 = vector.shape_cast %107 : vector<8x8xf32> to vector<1x1x8x8xf32>
    tpu.vector_store %arg9[%c1_48, %c0_49, %c0_50, %c0_51], %110 {strides = array<i32>} : memref<2x4x8x8xf32, #tpu.memory_space<vmem>>, vector<1x1x8x8xf32>,
    %cst_52 = arith.constant dense<0.000000e+00> : vector<8x16xf32>
    %111 = tpu.matmul %107, %96, %cst_52 {dimension_numbers = #tpu.dot_dimension_numbers<[1], [0], [0], [1], [0, 0, 1, 1], [], []>} : vector<8x8xf32>, vector<8x16xf32>, vector<8x16xf32> -> vector<8x16xf32>
    %c8 = arith.constant 8 : index
    %c0_53 = arith.constant 0 : index
    %112 = vector.load %arg10[%c8, %c0_53] : memref<16x64xf32, #tpu.memory_space<vmem>>, vector<8x16xf32>
    tpu.vector_store %arg10[%c8, %c0_53], %111 {strides = array<i32>} : memref<16x64xf32, #tpu.memory_space<vmem>>, vector<8x16xf32>,
    %113 = vector.extract_strided_slice %9 {offsets = [8, 16], sizes = [8, 16], strides = [1, 1]} : vector<16x64xf32> to vector<8x16xf32>
    %114 = vector.extract_strided_slice %13 {offsets = [8, 16], sizes = [8, 16], strides = [1, 1]} : vector<16x64xf32> to vector<8x16xf32>
    %115 = vector.extract_strided_slice %17 {offsets = [8, 16], sizes = [8, 16], strides = [1, 1]} : vector<16x64xf32> to vector<8x16xf32>
    %cst_54 = arith.constant dense<0.000000e+00> : vector<8x8xf32>
    %116 = tpu.matmul %113, %114, %cst_54 {dimension_numbers = #tpu.dot_dimension_numbers<[1], [1], [0], [0], [0, 0, 1, 0], [], []>} : vector<8x16xf32>, vector<8x16xf32>, vector<8x8xf32> -> vector<8x8xf32>
    %cst_55 = arith.constant dense<0xFF800000> : vector<8xf32>
    %117 = vector.multi_reduction <maximumf>, %116, %cst_55 [1] : vector<8x8xf32> to vector<8xf32>
    %118 = vector.shape_cast %117 : vector<8xf32> to vector<8x1xf32>
    %119 = vector.broadcast %118 : vector<8x1xf32> to vector<8x8xf32>
    %120 = arith.subf %116, %119 : vector<8x8xf32>
    %121 = math.exp %120 : vector<8x8xf32>
    %cst_56 = arith.constant dense<0.000000e+00> : vector<8xf32>
    %122 = vector.multi_reduction <add>, %121, %cst_56 [1] : vector<8x8xf32> to vector<8xf32>
    %123 = vector.shape_cast %122 : vector<8xf32> to vector<8x1xf32>
    %124 = tpu.reciprocal %123 : vector<8x1xf32> -> vector<8x1xf32>
    %125 = vector.broadcast %124 : vector<8x1xf32> to vector<8x8xf32>
    %126 = arith.mulf %121, %125 : vector<8x8xf32>
    %c1_57 = arith.constant 1 : index
    %c1_58 = arith.constant 1 : index
    %c0_59 = arith.constant 0 : index
    %c0_60 = arith.constant 0 : index
    %127 = vector.load %arg9[%c1_57, %c1_58, %c0_59, %c0_60] : memref<2x4x8x8xf32, #tpu.memory_space<vmem>>, vector<1x1x8x8xf32>
    %128 = vector.shape_cast %127 : vector<1x1x8x8xf32> to vector<8x8xf32>
    %129 = vector.shape_cast %126 : vector<8x8xf32> to vector<1x1x8x8xf32>
    tpu.vector_store %arg9[%c1_57, %c1_58, %c0_59, %c0_60], %129 {strides = array<i32>} : memref<2x4x8x8xf32, #tpu.memory_space<vmem>>, vector<1x1x8x8xf32>,
    %cst_61 = arith.constant dense<0.000000e+00> : vector<8x16xf32>
    %130 = tpu.matmul %126, %115, %cst_61 {dimension_numbers = #tpu.dot_dimension_numbers<[1], [0], [0], [1], [0, 0, 1, 1], [], []>} : vector<8x8xf32>, vector<8x16xf32>, vector<8x16xf32> -> vector<8x16xf32>
    %c8_62 = arith.constant 8 : index
    %c16_63 = arith.constant 16 : index
    %131 = vector.load %arg10[%c8_62, %c16_63] : memref<16x64xf32, #tpu.memory_space<vmem>>, vector<8x16xf32>
    tpu.vector_store %arg10[%c8_62, %c16_63], %130 {strides = array<i32>} : memref<16x64xf32, #tpu.memory_space<vmem>>, vector<8x16xf32>,
    %132 = vector.extract_strided_slice %9 {offsets = [8, 32], sizes = [8, 16], strides = [1, 1]} : vector<16x64xf32> to vector<8x16xf32>
    %133 = vector.extract_strided_slice %13 {offsets = [8, 32], sizes = [8, 16], strides = [1, 1]} : vector<16x64xf32> to vector<8x16xf32>
    %134 = vector.extract_strided_slice %17 {offsets = [8, 32], sizes = [8, 16], strides = [1, 1]} : vector<16x64xf32> to vector<8x16xf32>
    %cst_64 = arith.constant dense<0.000000e+00> : vector<8x8xf32>
    %135 = tpu.matmul %132, %133, %cst_64 {dimension_numbers = #tpu.dot_dimension_numbers<[1], [1], [0], [0], [0, 0, 1, 0], [], []>} : vector<8x16xf32>, vector<8x16xf32>, vector<8x8xf32> -> vector<8x8xf32>
    %cst_65 = arith.constant dense<0xFF800000> : vector<8xf32>
    %136 = vector.multi_reduction <maximumf>, %135, %cst_65 [1] : vector<8x8xf32> to vector<8xf32>
    %137 = vector.shape_cast %136 : vector<8xf32> to vector<8x1xf32>
    %138 = vector.broadcast %137 : vector<8x1xf32> to vector<8x8xf32>
    %139 = arith.subf %135, %138 : vector<8x8xf32>
    %140 = math.exp %139 : vector<8x8xf32>
    %cst_66 = arith.constant dense<0.000000e+00> : vector<8xf32>
    %141 = vector.multi_reduction <add>, %140, %cst_66 [1] : vector<8x8xf32> to vector<8xf32>
    %142 = vector.shape_cast %141 : vector<8xf32> to vector<8x1xf32>
    %143 = tpu.reciprocal %142 : vector<8x1xf32> -> vector<8x1xf32>
    %144 = vector.broadcast %143 : vector<8x1xf32> to vector<8x8xf32>
    %145 = arith.mulf %140, %144 : vector<8x8xf32>
    %c1_67 = arith.constant 1 : index
    %c2_68 = arith.constant 2 : index
    %c0_69 = arith.constant 0 : index
    %c0_70 = arith.constant 0 : index
    %146 = vector.load %arg9[%c1_67, %c2_68, %c0_69, %c0_70] : memref<2x4x8x8xf32, #tpu.memory_space<vmem>>, vector<1x1x8x8xf32>
    %147 = vector.shape_cast %146 : vector<1x1x8x8xf32> to vector<8x8xf32>
    %148 = vector.shape_cast %145 : vector<8x8xf32> to vector<1x1x8x8xf32>
    tpu.vector_store %arg9[%c1_67, %c2_68, %c0_69, %c0_70], %148 {strides = array<i32>} : memref<2x4x8x8xf32, #tpu.memory_space<vmem>>, vector<1x1x8x8xf32>,
    %cst_71 = arith.constant dense<0.000000e+00> : vector<8x16xf32>
    %149 = tpu.matmul %145, %134, %cst_71 {dimension_numbers = #tpu.dot_dimension_numbers<[1], [0], [0], [1], [0, 0, 1, 1], [], []>} : vector<8x8xf32>, vector<8x16xf32>, vector<8x16xf32> -> vector<8x16xf32>
    %c8_72 = arith.constant 8 : index
    %c32_73 = arith.constant 32 : index
    %150 = vector.load %arg10[%c8_72, %c32_73] : memref<16x64xf32, #tpu.memory_space<vmem>>, vector<8x16xf32>
    tpu.vector_store %arg10[%c8_72, %c32_73], %149 {strides = array<i32>} : memref<16x64xf32, #tpu.memory_space<vmem>>, vector<8x16xf32>,
    %151 = vector.extract_strided_slice %9 {offsets = [8, 48], sizes = [8, 16], strides = [1, 1]} : vector<16x64xf32> to vector<8x16xf32>
    %152 = vector.extract_strided_slice %13 {offsets = [8, 48], sizes = [8, 16], strides = [1, 1]} : vector<16x64xf32> to vector<8x16xf32>
    %153 = vector.extract_strided_slice %17 {offsets = [8, 48], sizes = [8, 16], strides = [1, 1]} : vector<16x64xf32> to vector<8x16xf32>
    %cst_74 = arith.constant dense<0.000000e+00> : vector<8x8xf32>
    %154 = tpu.matmul %151, %152, %cst_74 {dimension_numbers = #tpu.dot_dimension_numbers<[1], [1], [0], [0], [0, 0, 1, 0], [], []>} : vector<8x16xf32>, vector<8x16xf32>, vector<8x8xf32> -> vector<8x8xf32>
    %cst_75 = arith.constant dense<0xFF800000> : vector<8xf32>
    %155 = vector.multi_reduction <maximumf>, %154, %cst_75 [1] : vector<8x8xf32> to vector<8xf32>
    %156 = vector.shape_cast %155 : vector<8xf32> to vector<8x1xf32>
    %157 = vector.broadcast %156 : vector<8x1xf32> to vector<8x8xf32>
    %158 = arith.subf %154, %157 : vector<8x8xf32>
    %159 = math.exp %158 : vector<8x8xf32>
    %cst_76 = arith.constant dense<0.000000e+00> : vector<8xf32>
    %160 = vector.multi_reduction <add>, %159, %cst_76 [1] : vector<8x8xf32> to vector<8xf32>
    %161 = vector.shape_cast %160 : vector<8xf32> to vector<8x1xf32>
    %162 = tpu.reciprocal %161 : vector<8x1xf32> -> vector<8x1xf32>
    %163 = vector.broadcast %162 : vector<8x1xf32> to vector<8x8xf32>
    %164 = arith.mulf %159, %163 : vector<8x8xf32>
    %c1_77 = arith.constant 1 : index
    %c3_78 = arith.constant 3 : index
    %c0_79 = arith.constant 0 : index
    %c0_80 = arith.constant 0 : index
    %165 = vector.load %arg9[%c1_77, %c3_78, %c0_79, %c0_80] : memref<2x4x8x8xf32, #tpu.memory_space<vmem>>, vector<1x1x8x8xf32>
    %166 = vector.shape_cast %165 : vector<1x1x8x8xf32> to vector<8x8xf32>
    %167 = vector.shape_cast %164 : vector<8x8xf32> to vector<1x1x8x8xf32>
    tpu.vector_store %arg9[%c1_77, %c3_78, %c0_79, %c0_80], %167 {strides = array<i32>} : memref<2x4x8x8xf32, #tpu.memory_space<vmem>>, vector<1x1x8x8xf32>,
    %cst_81 = arith.constant dense<0.000000e+00> : vector<8x16xf32>
    %168 = tpu.matmul %164, %153, %cst_81 {dimension_numbers = #tpu.dot_dimension_numbers<[1], [0], [0], [1], [0, 0, 1, 1], [], []>} : vector<8x8xf32>, vector<8x16xf32>, vector<8x16xf32> -> vector<8x16xf32>
    %c8_82 = arith.constant 8 : index
    %c48_83 = arith.constant 48 : index
    %169 = vector.load %arg10[%c8_82, %c48_83] : memref<16x64xf32, #tpu.memory_space<vmem>>, vector<8x16xf32>
    tpu.vector_store %arg10[%c8_82, %c48_83], %168 {strides = array<i32>} : memref<16x64xf32, #tpu.memory_space<vmem>>, vector<8x16xf32>,
    %c0_84 = arith.constant 0 : index
    %c0_85 = arith.constant 0 : index
    %170 = vector.load %arg10[%c0_84, %c0_85] : memref<16x64xf32, #tpu.memory_space<vmem>>, vector<16x64xf32>
    %c0_86 = arith.constant 0 : index
    %c0_87 = arith.constant 0 : index
    %171 = vector.load %arg6[%c0_86, %c0_87] : memref<64x64xf32, #tpu.memory_space<vmem>>, vector<64x64xf32>
    %cst_88 = arith.constant dense<0.000000e+00> : vector<16x64xf32>
    %172 = tpu.matmul %170, %171, %cst_88 {dimension_numbers = #tpu.dot_dimension_numbers<[1], [0], [0], [1], [0, 0, 1, 1], [], []>} : vector<16x64xf32>, vector<64x64xf32>, vector<16x64xf32> -> vector<16x64xf32>
    %c0_89 = arith.constant 0 : index
    %c0_90 = arith.constant 0 : index
    %173 = vector.load %arg7[%c0_89, %c0_90] : memref<1x64xf32, #tpu.memory_space<vmem>>, vector<1x64xf32>
    %174 = vector.broadcast %173 : vector<1x64xf32> to vector<16x64xf32>
    %175 = arith.addf %172, %174 : vector<16x64xf32>
    %176 = vector.extract_strided_slice %175 {offsets = [0, 0], sizes = [8, 64], strides = [1, 1]} : vector<16x64xf32> to vector<8x64xf32>
    %c0_91 = arith.constant 0 : index
    %c0_92 = arith.constant 0 : index
    %177 = vector.load %arg8[%c0_91, %c0_92] : memref<8x128xf32, #tpu.memory_space<vmem>>, vector<8x64xf32>
    tpu.vector_store %arg8[%c0_91, %c0_92], %176 {strides = array<i32>} : memref<8x128xf32, #tpu.memory_space<vmem>>, vector<8x64xf32>,
    %178 = vector.extract_strided_slice %175 {offsets = [8, 0], sizes = [8, 64], strides = [1, 1]} : vector<16x64xf32> to vector<8x64xf32>
    %c0_93 = arith.constant 0 : index
    %c64_94 = arith.constant 64 : index
    %179 = vector.load %arg8[%c0_93, %c64_94] : memref<8x128xf32, #tpu.memory_space<vmem>>, vector<8x64xf32>
    tpu.vector_store %arg8[%c0_93, %c64_94], %178 {strides = array<i32>} : memref<8x128xf32, #tpu.memory_space<vmem>>, vector<8x64xf32>,
    return
  }
  func.func @transform_0(%arg0: i32) -> (i32, i32) {
    %c0_i32 = arith.constant 0 : i32
    %c0_i32_0 = arith.constant 0 : i32
    return %arg0, %c0_i32 : i32, i32
  }
  func.func @transform_1(%arg0: i32) -> (i32, i32) {
    %c0_i32 = arith.constant 0 : i32
    %c0_i32_0 = arith.constant 0 : i32
    return %arg0, %c0_i32 : i32, i32
  }
  func.func @transform_2(%arg0: i32) -> (i32, i32) {
    %c0_i32 = arith.constant 0 : i32
    %c0_i32_0 = arith.constant 0 : i32
    return %arg0, %c0_i32 : i32, i32
  }
  func.func @transform_3(%arg0: i32) -> (i32, i32) {
    %c0_i32 = arith.constant 0 : i32
    %c0_i32_0 = arith.constant 0 : i32
    %c0_i32_1 = arith.constant 0 : i32
    return %c0_i32, %c0_i32_0 : i32, i32
  }
  func.func @transform_4(%arg0: i32) -> (i32, i32) {
    %c0_i32 = arith.constant 0 : i32
    %c0_i32_0 = arith.constant 0 : i32
    %c0_i32_1 = arith.constant 0 : i32
    return %c0_i32, %c0_i32_0 : i32, i32
  }
  func.func @transform_5(%arg0: i32) -> (i32, i32) {
    %c0_i32 = arith.constant 0 : i32
    %c0_i32_0 = arith.constant 0 : i32
    %c0_i32_1 = arith.constant 0 : i32
    return %c0_i32, %c0_i32_0 : i32, i32
  }
  func.func @transform_6(%arg0: i32) -> (i32, i32) {
    %c0_i32 = arith.constant 0 : i32
    %c0_i32_0 = arith.constant 0 : i32
    %c0_i32_1 = arith.constant 0 : i32
    return %c0_i32, %c0_i32_0 : i32, i32
  }
  func.func @transform_7(%arg0: i32) -> (i32, i32) {
    %c0_i32 = arith.constant 0 : i32
    %c0_i32_0 = arith.constant 0 : i32
    return %c0_i32, %arg0 : i32, i32
  }
  func.func @transform_8(%arg0: i32) -> (i32, i32, i32, i32) {
    %c0_i32 = arith.constant 0 : i32
    %c0_i32_0 = arith.constant 0 : i32
    %c0_i32_1 = arith.constant 0 : i32
    %c0_i32_2 = arith.constant 0 : i32
    return %arg0, %c0_i32, %c0_i32_0, %c0_i32_1 : i32, i32, i32, i32
  }
}

</mosaic_0001>

<bundles_post_ra>
// kernel: multi_head_attention.1
= control target key start
LH: loop header
LB: loop body
LE: loop exit
PB: predicated region body
PF: predicated region fallthrough
CT: control target
= control target key end

     0   :  { %v1920_v4 = vmov 0.0   ;;  %s2273_s0 = inlined_call_operand.vmem [shape: f32[16,64], index: 0, kind: input, shape index: {}]   ;;  %s2274_s1 = inlined_call_operand.vmem [shape: f32[16,64], index: 1, kind: input, shape index: {}]   ;;  %s2275_s2 = inlined_call_operand.vmem [shape: f32[16,64], index: 2, kind: input, shape index: {}]   ;;  %s2276_s3 = inlined_call_operand.vmem [shape: f32[64,192], index: 3, kind: input, shape index: {}]   ;;  %s2277_s4 = inlined_call_operand.vmem [shape: f32[1,192], index: 4, kind: input, shape index: {}]   ;;  %s2278_s5 = inlined_call_operand.vmem [shape: f32[64,64], index: 5, kind: input, shape index: {}]   ;;  %s2279_s6 = inlined_call_operand.vmem [shape: f32[1,64], index: 6, kind: input, shape index: {}]   ;;  %s2280_s7 = inlined_call_operand.vmem [shape: f32[8,128], index: 7, kind: output, shape index: {0}]   ;;  %s2281_s8 = inlined_call_operand.hbm [shape: f32[2,4,8,8], index: 8, kind: output, shape index: {1}]  }
   0x1   :  { %v50_v0 = vld [vmem:[%s2276_s3 + $0x78] sm:$0xff]  ;;  %v49_v1 = vld [vmem:[%s2276_s3 + $0x70] sm:$0xff]  ;;  %v48_v2 = vld [vmem:[%s2276_s3 + $0x68] sm:$0xff]  ;;  %134 = vmatprep.mubr.f32.mxu0 %v1920_v4  ;;  %1760 = vmatprep.subr.mxu1 %v1920_v4 }
   0x2   :  { %86 = vmatprep.subr.mxu0 %v50_v0  ;;  %v47_v3 = vld [vmem:[%s2276_s3 + $0x60] sm:$0xff]  ;;  %v46_v5 = vld [vmem:[%s2276_s3 + $0x58] sm:$0xff]  ;;  %v45_v6 = vld [vmem:[%s2276_s3 + $0x50] sm:$0xff] }
   0x3   :  { %87 = vmatpush1.msra.mxu0 %v49_v1  ;;  %v44_v7 = vld [vmem:[%s2276_s3 + $0x48] sm:$0xff]  ;;  %v43_v8 = vld [vmem:[%s2276_s3 + $0x40] sm:$0xff]  ;;  %v42_v9 = vld [vmem:[%s2276_s3 + $0x38] sm:$0xff] }
   0x4   :  { %88 = vmatprep.subr.mxu0 %v48_v2 }
   0x5   :  { %89 = vmatpush1.msra.mxu0 %v47_v3 }
   0x6   :  { %90 = vmatprep.subr.mxu0 %v46_v5 }
   0x7   :  { %91 = vmatpush1.msra.mxu0 %v45_v6 }
   0x8   :  { %14 = vsyncpa [#allocation4], 0  ;;  %92 = vmatprep.subr.mxu0 %v44_v7  ;;  %v41_v10 = vld [vmem:[%s2276_s3 + $0x30] sm:$0xff]  ;;  %v40_v11 = vld [vmem:[%s2276_s3 + $0x28] sm:$0xff]  ;;  %vm51_vm0 = vcmask 523264   ;;  %vm1921_vm1 = vmmov 0  }
   0x9   :  { %93 = vmatpush1.msra.mxu0 %v43_v8  ;;  %v39_v12 = vld [vmem:[%s2276_s3 + $0x20] sm:$0xff]  ;;  %v38_v13 = vld [vmem:[%s2276_s3 + $0x18] sm:$0xff]  ;;  %v37_v14 = vld [vmem:[%s2276_s3 + $0x10] sm:$0xff]  ;;  %1762 = vmatprep.mubr.msk.f32.mxu1 %vm1921_vm1, %v1920_v4  ;;  %s1923_s26 = smov 64   ;;  %vm188_vm2 = vcmask 130048   ;;  %vm264_vm3 = vcmask 64512  }
   0xa   :  { %94 = vmatprep.subr.mxu0 %v42_v9  ;;  %v36_v15 = vld [vmem:[%s2276_s3 + $0x8] sm:$0xff]  ;;  %v35_v16 = vld [vmem:[%s2276_s3] sm:$0xff]  ;;  %s1925_s29 = smov 96   ;;  %s1926_s30 = smov 32   ;;  %vm523_vm4 = vcmask 261248   ;;  %vm696_vm5 = vcmask 392448  }
   0xb   :  { %95 = vmatpush1.msra.mxu0 %v41_v10  ;;  %v29_v17 = vld [vmem:[%s2273_s0] sm:$0xff]  ;;  %v30_v18 = vld [vmem:[%s2273_s0 + $0x8] sm:$0xff]  ;;  %s1927_s9 = smov 80   ;;  %s1928_s10 = smov 16   ;;  %vm869_vm6 = vcmask 523648  }
   0xc   :  { %96 = vmatprep.subr.mxu0 %v40_v11  ;;  %v31_v19 = vld [vmem:[%s2274_s1] sm:$0xff]  ;;  %v32_v20 = vld [vmem:[%s2274_s1 + $0x8] sm:$0xff] }
   0xd   :  { %97 = vmatpush1.msra.mxu0 %v39_v12  ;;  %v33_v21 = vld [vmem:[%s2275_s2] sm:$0xff]  ;;  %v34_v22 = vld [vmem:[%s2275_s2 + $0x8] sm:$0xff]  ;;  %s1922_s2 = smov 48  }
   0xe   :  { %98 = vmatprep.subr.mxu0 %v38_v13  ;;  %v2066_v27 = vld [vmem:[%s2277_s4] ss:$0 sm:$0xff]  ;;  %v1685_v34 = vld [vmem:[%s2277_s4 + $0x1] ss:$0 sm:$0xff]  ;;  %s1924_s4 = smov 112  }
   0xf   :  { %99 = vmatpush1.msra.mxu0 %v37_v14 }
  0x10   :  { %100 = vmatprep.subr.mxu0 %v36_v15 }
  0x11   :  { %101 = vmatpush1.msra.mxu0 %v35_v16 }
  0x12   :  { %1678 = vmatmul.mubr.msk.f32.vlgmr.msra.gmra.mxu0 %vm51_vm0, %v29_v17  ;;  %1755 = vmatprep.subr.mxu0 %v1920_v4 }
  0x13   :  { %139 = vmatprep.mubr.f32.mxu0 %v1920_v4 }
  0x16   :  { %1679 = vmatmul.mubr.msk.f32.gmra.mxu0 %vm51_vm0, %v30_v18 }
  0x17   :  { %144 = vmatprep.mubr.f32.mxu0 %v1920_v4 }
  0x1a   :  { %1680 = vmatmul.mubr.msk.f32.gmra.mxu0 %vm51_vm0, %v31_v19 }
  0x1b   :  { %149 = vmatprep.mubr.f32.mxu0 %v1920_v4 }
  0x1e   :  { %1681 = vmatmul.mubr.msk.f32.gmra.mxu0 %vm51_vm0, %v32_v20 }
  0x1f   :  { %154 = vmatprep.mubr.f32.mxu0 %v1920_v4 }
  0x22   :  { %1682 = vmatmul.mubr.msk.f32.gmra.mxu0 %vm51_vm0, %v33_v21 }
  0x23   :  { %159 = vmatprep.mubr.f32.mxu0 %v1920_v4 }
  0x26   :  { %1683 = vmatmul.mubr.msk.f32.gmra.mxu0 %vm51_vm0, %v34_v22 }
  0x27   :  { %1757 = vmatprep.mubr.msk.f32.mxu0 %vm1921_vm1, %v1920_v4 }
  0xd2   :  { %v136_v23 = vpop.f32.mrf.mxu0 }
  0xd3   :  { %v2088_v41 = vadd.f32 %v2066_v27, %v136_v23 }
  0xd4   :  { %v138_v24 = vpop.f32.mrf.mxu0 }
  0xd6   :  { %v2061_v25 = vpop.f32.mrf.mxu0 }
  0xd8   :  { %v143_v26 = vpop.f32.mrf.mxu0 }
  0xda   :  { %v146_v28 = vpop.f32.mrf.mxu0 }
  0xdb   :  { %v2069_v29 = vadd.f32 %v2066_v27, %v146_v28 }
  0xdc   :  { %v148_v30 = vpop.f32.mrf.mxu0 }
  0xdd   :  { %353 = vrot.lane.b32.xlu1 %v2069_v29, %s1922_s2  ;;  %186 = vrot.lane.b32.xlu0 %v2069_v29, %s1923_s26 }
  0xde   :  { %v2075_v31 = vpop.f32.mrf.mxu0 }
  0xe0   :  { %v153_v32 = vpop.f32.mrf.mxu0 }
  0xe1   :  { %v175_v32 = vadd.f32 %v2066_v27, %v2075_v31 }
  0xe2   :  { %v156_v33 = vpop.f32.mrf.mxu0 }
  0xe3   :  { %v173_v33 = vadd.f32 %v2066_v27, %v2061_v25 }
  0xe4   :  { %v157_v35 = vpop.f32.mrf.mxu0 }
  0xe5   :  { %v2080_v36 = vadd.f32 %v1685_v34, %v157_v35 }
  0xe6   :  { %v161_v37 = vpop.f32.mrf.mxu0 }
  0xe7   :  { %1761 = vmatpush3.msra.mxu1 %v2080_v36 }
  0xe8   :  { %1765 = vmatprep.subr.mxu1 %v1920_v4  ;;  %v162_v38 = vpop.f32.mrf.mxu0 }
  0xe9   :  { %v2085_v40 = vadd.f32 %v1685_v34, %v162_v38 }
 0x14f   :  { %v187_v39 = vpop.permute.xlu0 %186  ;;  %v354_v50 = vpop.permute.xlu1 %353 }
 0x150   :  { %1756 = vmatpush3.xpose.msk.msra.mxu0 %vm188_vm2, %v187_v39 }
 0x151   :  { %1800 = vmatprep.subr.mxu0 %v1920_v4 }
 0x153   :  { %1758 = vmatmul.mubr.msk.f32.vlgmr.msra.gmra.mxu0 %vm188_vm2, %v2088_v41 }
 0x154   :  { %1801 = vmatpush3.msra.mxu0 %v2085_v40  ;;  %1802 = vmatprep.mubr.msk.f32.mxu0 %vm1921_vm1, %v1920_v4 }
 0x155   :  { %1810 = vmatprep.subr.mxu0 %v1920_v4 }
 0x213   :  { %v260_v42 = vpop.f32.mrf.mxu0 }
 0x214   :  { %v265_v43 = vsel %vm264_vm3, %v260_v42, -inf }
 0x215   :  { %266 = vmax.xlane.f32.xlu0 %v265_v43  ;;  %v1759_v44 = vpop.f32.mrf.mxu0 }
 0x22b   :  { %443 = vrot.lane.b32.xlu0 %v2080_v36, %s1924_s4 }
 0x29e   :  { %v267_v45 = vpop.xlane.xlu0 %266 }
 0x29f   :  { %v268_v46 = vsub.f32 %v260_v42, %v267_v45 }
 0x2a1   :  { %v269_v47 = vmul.f32 1.442695, %v268_v46 }
 0x2a2   :  { %v444_v55 = vpop.permute.xlu0 %443 }
 0x2a3   :  { %1866 = vpow2.f32 %v269_v47 }
 0x2b0   :  { %v1867_v48 = vpop.eup %1866 }
 0x2b1   :  { %v271_v49 = vsel %vm264_vm3, %v1867_v48, 0.0 }
 0x2b2   :  { %272 = vadd.xlane.f32.xlu1 %v271_v49 }
 0x2c3   :  { %351 = vrot.lane.b32.xlu1 %v2088_v41, %s1924_s4 }
 0x33b   :  { %v273_v51 = vpop.xlane.xlu1 %272 }
 0x33c   :  { %1868 = vrcp.f32 %v273_v51 }
 0x33f   :  { %v352_v54 = vpop.permute.xlu1 %351 }
 0x349   :  { %v1869_v52 = vpop.eup %1868 }
 0x34a   :  { %v275_v53 = vmul.f32 %v1869_v52, %v1867_v48 }
 0x34c   :  { %276 = vst.msk [vmem:[#allocation3] sm:$0xff] %vm264_vm3, %v275_v53  ;;  %1763 = vmatmul.mubr.msk.f32.vlgmr.msra.gmra.mxu1 %vm264_vm3, %v275_v53 }
 0x34d   :  { %1766 = vmatpush3.xpose.msk.msra.mxu1 %vm188_vm2, %v354_v50  ;;  %1767 = vmatprep.mubr.msk.f32.mxu1 %vm1921_vm1, %v1920_v4 }
 0x34e   :  { %1770 = vmatprep.subr.mxu1 %v1920_v4 }
 0x350   :  { %1768 = vmatmul.mubr.msk.f32.vlgmr.msra.gmra.mxu1 %vm188_vm2, %v352_v54 }
 0x351   :  { %1771 = vmatpush3.msra.mxu1 %v444_v55  ;;  %1772 = vmatprep.mubr.msk.f32.mxu1 %vm1921_vm1, %v1920_v4 }
 0x352   :  { %1775 = vmatprep.subr.mxu1 %v1920_v4 }
 0x40c   :  { %v346_v56 = vpop.f32.mrf.mxu1 }
 0x40d   :  { %350 = vst.msk [vmem:[#allocation2] sm:$0xff] %vm188_vm2, %v346_v56 }
 0x40e   :  { %v1764_v57 = vpop.f32.mrf.mxu1 }
 0x410   :  { %v425_v58 = vpop.f32.mrf.mxu1 }
 0x411   :  { %v429_v59 = vsel %vm264_vm3, %v425_v58, -inf }
 0x412   :  { %430 = vmax.xlane.f32.xlu1 %v429_v59  ;;  %v1769_v60 = vpop.f32.mrf.mxu1 }
 0x423   :  { %525 = vrot.lane.b32.xlu1 %v2088_v41, %s1925_s29 }
 0x49b   :  { %v431_v61 = vpop.xlane.xlu1 %430 }
 0x49c   :  { %v432_v62 = vsub.f32 %v425_v58, %v431_v61 }
 0x49e   :  { %v433_v63 = vmul.f32 1.442695, %v432_v62 }
 0x49f   :  { %v526_v7 = vpop.permute.xlu1 %525 }
 0x4a0   :  { %1870 = vpow2.f32 %v433_v63 }
 0x4ad   :  { %v1871_v0 = vpop.eup %1870 }
 0x4ae   :  { %v435_v1 = vsel %vm264_vm3, %v1871_v0, 0.0 }
 0x4af   :  { %436 = vadd.xlane.f32.xlu0 %v435_v1 }
 0x4c5   :  { %527 = vrot.lane.b32.xlu0 %v2069_v29, %s1926_s30 }
 0x538   :  { %v437_v2 = vpop.xlane.xlu0 %436 }
 0x539   :  { %1872 = vrcp.f32 %v437_v2 }
 0x53c   :  { %v528_v6 = vpop.permute.xlu0 %527 }
 0x546   :  { %v1873_v3 = vpop.eup %1872 }
 0x547   :  { %v439_v5 = vmul.f32 %v1873_v3, %v1871_v0 }
 0x549   :  { %441 = vst.msk [vmem:[#allocation3 + $0x8] sm:$0xff] %vm264_vm3, %v439_v5  ;;  %1773 = vmatmul.mubr.msk.f32.vlgmr.msra.gmra.mxu1 %vm264_vm3, %v439_v5 }
 0x54a   :  { %1776 = vmatpush3.xpose.msk.msra.mxu1 %vm188_vm2, %v528_v6  ;;  %1777 = vmatprep.mubr.msk.f32.mxu1 %vm1921_vm1, %v1920_v4 }
 0x54b   :  { %1780 = vmatprep.subr.mxu1 %v1920_v4 }
 0x54d   :  { %1778 = vmatmul.mubr.msk.f32.vlgmr.msra.gmra.mxu1 %vm188_vm2, %v526_v7 }
 0x54e   :  { %1782 = vmatprep.mubr.msk.f32.mxu1 %vm1921_vm1, %v1920_v4 }
 0x609   :  { %v2129_v8 = vpop.f32.mrf.mxu1 }
 0x60b   :  { %v1774_v9 = vpop.f32.mrf.mxu1 }
 0x60d   :  { %v599_v10 = vpop.f32.mrf.mxu1 }
 0x60e   :  { %v603_v11 = vsel %vm264_vm3, %v599_v10, -inf }
 0x60f   :  { %604 = vmax.xlane.f32.xlu0 %v603_v11  ;;  %v1779_v12 = vpop.f32.mrf.mxu1 }
 0x625   :  { %616 = vrot.lane.b32.xlu0 %v2080_v36, %s1925_s29 }
 0x629   :  { %698 = vrot.lane.b32.xlu0 %v2088_v41, %s1927_s9 }
 0x698   :  { %v605_v13 = vpop.xlane.xlu0 %604 }
 0x699   :  { %v606_v14 = vsub.f32 %v599_v10, %v605_v13 }
 0x69b   :  { %v607_v15 = vmul.f32 1.442695, %v606_v14 }
 0x69c   :  { %v617_v16 = vpop.permute.xlu0 %616 }
 0x69d   :  { %1874 = vpow2.f32 %v607_v15  ;;  %1781 = vmatpush3.msra.mxu1 %v617_v16 }
 0x69e   :  { %1785 = vmatprep.subr.mxu1 %v1920_v4 }
 0x6a0   :  { %v699_v23 = vpop.permute.xlu0 %698 }
 0x6aa   :  { %v1875_v17 = vpop.eup %1874 }
 0x6ab   :  { %v609_v18 = vsel %vm264_vm3, %v1875_v17, 0.0 }
 0x6ac   :  { %610 = vadd.xlane.f32.xlu1 %v609_v18 }
 0x6bd   :  { %700 = vrot.lane.b32.xlu1 %v2069_v29, %s1928_s10 }
 0x735   :  { %v611_v19 = vpop.xlane.xlu1 %610 }
 0x736   :  { %1876 = vrcp.f32 %v611_v19 }
 0x739   :  { %v701_v22 = vpop.permute.xlu1 %700 }
 0x743   :  { %v1877_v20 = vpop.eup %1876 }
 0x744   :  { %v613_v21 = vmul.f32 %v1877_v20, %v1875_v17 }
 0x746   :  { %615 = vst.msk [vmem:[#allocation3 + $0x10] sm:$0xff] %vm264_vm3, %v613_v21  ;;  %1783 = vmatmul.mubr.msk.f32.vlgmr.msra.gmra.mxu1 %vm264_vm3, %v613_v21 }
 0x747   :  { %1786 = vmatpush3.xpose.msk.msra.mxu1 %vm188_vm2, %v701_v22  ;;  %1787 = vmatprep.mubr.msk.f32.mxu1 %vm1921_vm1, %v1920_v4 }
 0x748   :  { %1790 = vmatprep.subr.mxu1 %v1920_v4 }
 0x74a   :  { %1788 = vmatmul.mubr.msk.f32.vlgmr.msra.gmra.mxu1 %vm188_vm2, %v699_v23 }
 0x74b   :  { %1792 = vmatprep.mubr.msk.f32.mxu1 %vm1921_vm1, %v1920_v4 }
 0x806   :  { %v2149_v24 = vpop.f32.mrf.mxu1 }
 0x808   :  { %v1784_v26 = vpop.f32.mrf.mxu1 }
 0x80a   :  { %v772_v28 = vpop.f32.mrf.mxu1 }
 0x80b   :  { %v776_v29 = vsel %vm264_vm3, %v772_v28, -inf }
 0x80c   :  { %777 = vmax.xlane.f32.xlu0 %v776_v29  ;;  %v1789_v30 = vpop.f32.mrf.mxu1 }
 0x822   :  { %789 = vrot.lane.b32.xlu0 %v2080_v36, %s1927_s9 }
 0x826   :  { %1038 = vrot.lane.b32.xlu0 %v175_v32, %s1922_s2 }
 0x82a   :  { %1036 = vrot.lane.b32.xlu0 %v173_v33, %s1924_s4 }
 0x82e   :  { %1211 = vrot.lane.b32.xlu0 %v175_v32, %s1926_s30 }
 0x832   :  { %1383 = vrot.lane.b32.xlu0 %v175_v32, %s1928_s10 }
 0x895   :  { %v778_v34 = vpop.xlane.xlu0 %777 }
 0x896   :  { %v779_v35 = vsub.f32 %v772_v28, %v778_v34 }
 0x898   :  { %v780_v37 = vmul.f32 1.442695, %v779_v35 }
 0x899   :  { %v790_v38 = vpop.permute.xlu0 %789 }
 0x89a   :  { %1878 = vpow2.f32 %v780_v37  ;;  %1791 = vmatpush3.msra.mxu1 %v790_v38 }
 0x89b   :  { %1795 = vmatprep.subr.mxu1 %v1920_v4 }
 0x89d   :  { %v1039_v27 = vpop.permute.xlu0 %1038 }
 0x8a1   :  { %v1037_v42 = vpop.permute.xlu0 %1036 }
 0x8a5   :  { %v1212_v44 = vpop.permute.xlu0 %1211 }
 0x8a7   :  { %v1879_v31 = vpop.eup %1878 }
 0x8a8   :  { %v782_v36 = vsel %vm264_vm3, %v1879_v31, 0.0 }
 0x8a9   :  { %783 = vadd.xlane.f32.xlu1 %v782_v36  ;;  %v1384_v46 = vpop.permute.xlu0 %1383 }
 0x8ba   :  { %872 = vrot.lane.b32.xlu1 %v175_v32, %s1923_s26 }
 0x8be   :  { %1209 = vrot.lane.b32.xlu1 %v173_v33, %s1925_s29 }
 0x8c2   :  { %1381 = vrot.lane.b32.xlu1 %v173_v33, %s1927_s9 }
 0x932   :  { %v784_v25 = vpop.xlane.xlu1 %783 }
 0x933   :  { %1880 = vrcp.f32 %v784_v25  ;;  %v1562_v25 = vld [vmem:[%s2278_s5 + $0x38] sm:$0xff] }
 0x936   :  { %v873_v43 = vpop.permute.xlu1 %872 }
 0x93a   :  { %v1210_v45 = vpop.permute.xlu1 %1209 }
 0x93e   :  { %v1382_v47 = vpop.permute.xlu1 %1381 }
 0x940   :  { %v1881_v39 = vpop.eup %1880 }
 0x941   :  { %v786_v41 = vmul.f32 %v1881_v39, %v1879_v31  ;;  %v1559_v39 = vld [vmem:[%s2278_s5 + $0x20] sm:$0xff] }
 0x943   :  { %788 = vst.msk [vmem:[#allocation3 + $0x18] sm:$0xff] %vm264_vm3, %v786_v41  ;;  %1793 = vmatmul.mubr.msk.f32.vlgmr.msra.gmra.mxu1 %vm264_vm3, %v786_v41 }
 0x944   :  { %1796 = vmatpush3.xpose.msk.msra.mxu1 %vm188_vm2, %v873_v43  ;;  %1797 = vmatprep.mubr.msk.f32.mxu1 %vm1921_vm1, %v1920_v4  ;;  %v1557_v43 = vld [vmem:[%s2278_s5 + $0x10] sm:$0xff] }
 0x945   :  { %1805 = vmatprep.subr.mxu1 %v1920_v4 }
 0x947   :  { %1798 = vmatmul.mubr.msk.f32.vlgmr.msra.gmra.mxu1 %vm188_vm2, %v173_v33 }
 0x948   :  { %1806 = vmatpush3.xpose.msk.msra.mxu1 %vm188_vm2, %v1039_v27  ;;  %1807 = vmatprep.mubr.msk.f32.mxu1 %vm1921_vm1, %v1920_v4  ;;  %v1561_v27 = vld [vmem:[%s2278_s5 + $0x30] sm:$0xff] }
 0x949   :  { %1815 = vmatprep.subr.mxu1 %v1920_v4 }
 0x94b   :  { %1808 = vmatmul.mubr.msk.f32.vlgmr.msra.gmra.mxu1 %vm188_vm2, %v1037_v42  ;;  %v1558_v42 = vld [vmem:[%s2278_s5 + $0x18] sm:$0xff] }
 0x94c   :  { %1816 = vmatpush3.xpose.msk.msra.mxu1 %vm188_vm2, %v1212_v44  ;;  %1817 = vmatprep.mubr.msk.f32.mxu1 %vm1921_vm1, %v1920_v4 }
 0x94d   :  { %1825 = vmatprep.subr.mxu1 %v1920_v4 }
 0x94f   :  { %1818 = vmatmul.mubr.msk.f32.vlgmr.msra.gmra.mxu1 %vm188_vm2, %v1210_v45  ;;  %v1556_v45 = vld [vmem:[%s2278_s5 + $0x8] sm:$0xff] }
 0x950   :  { %1826 = vmatpush3.xpose.msk.msra.mxu1 %vm188_vm2, %v1384_v46  ;;  %1827 = vmatprep.mubr.msk.f32.mxu1 %vm1921_vm1, %v1920_v4 }
 0x951   :  { %1835 = vmatprep.subr.mxu1 %v1562_v25 }
 0x953   :  { %1828 = vmatmul.mubr.msk.f32.vlgmr.msra.gmra.mxu1 %vm188_vm2, %v1382_v47  ;;  %v1555_v47 = vld [vmem:[%s2278_s5] sm:$0xff] }
 0x954   :  { %1836 = vmatpush3.msra.mxu1 %v1562_v25 }
 0x955   :  { %1837 = vmatprep.subr.mxu1 %v1561_v27 }
 0x956   :  { %1838 = vmatpush3.msra.mxu1 %v1561_v27 }
 0xa03   :  { %v861_v48 = vpop.f32.mrf.mxu1 }
 0xa05   :  { %v1794_v49 = vpop.f32.mrf.mxu1 }
 0xa07   :  { %v945_v50 = vpop.f32.mrf.mxu1 }
 0xa08   :  { %v949_v51 = vsel %vm264_vm3, %v945_v50, -inf }
 0xa09   :  { %950 = vmax.xlane.f32.xlu0 %v949_v51  ;;  %v1799_v52 = vpop.f32.mrf.mxu1 }
 0xa0b   :  { %v1110_v53 = vpop.f32.mrf.mxu1 }
 0xa0c   :  { %v1114_v54 = vsel %vm264_vm3, %v1110_v53, -inf }
 0xa0d   :  { %1115 = vmax.xlane.f32.xlu1 %v1114_v54  ;;  %v1809_v55 = vpop.f32.mrf.mxu1 }
 0xa0f   :  { %v1283_v56 = vpop.f32.mrf.mxu1 }
 0xa10   :  { %v1287_v57 = vsel %vm264_vm3, %v1283_v56, -inf }
 0xa11   :  { %1288 = vmax.xlane.f32.xlu0 %v1287_v57  ;;  %v1819_v58 = vpop.f32.mrf.mxu1 }
 0xa13   :  { %v1455_v59 = vpop.f32.mrf.mxu1 }
 0xa14   :  { %v1459_v60 = vsel %vm264_vm3, %v1455_v59, -inf }
 0xa15   :  { %1460 = vmax.xlane.f32.xlu0 %v1459_v60  ;;  %v1829_v61 = vpop.f32.mrf.mxu1 }
 0xa1e   :  { %1128 = vrot.lane.b32.xlu1 %v2085_v40, %s1924_s4 }
 0xa92   :  { %v951_v62 = vpop.xlane.xlu0 %950 }
 0xa93   :  { %v952_v63 = vsub.f32 %v945_v50, %v951_v62 }
 0xa95   :  { %v953_v0 = vmul.f32 1.442695, %v952_v63 }
 0xa96   :  { %v1116_v1 = vpop.xlane.xlu1 %1115 }
 0xa97   :  { %1882 = vpow2.f32 %v953_v0  ;;  %v1117_v2 = vsub.f32 %v1110_v53, %v1116_v1 }
 0xa99   :  { %v1118_v3 = vmul.f32 1.442695, %v1117_v2 }
 0xa9a   :  { %v1289_v5 = vpop.xlane.xlu0 %1288  ;;  %v1129_v20 = vpop.permute.xlu1 %1128 }
 0xa9b   :  { %1884 = vpow2.f32 %v1118_v3  ;;  %v1290_v6 = vsub.f32 %v1283_v56, %v1289_v5 }
 0xa9d   :  { %v1291_v7 = vmul.f32 1.442695, %v1290_v6 }
 0xa9e   :  { %v1461_v9 = vpop.xlane.xlu0 %1460 }
 0xa9f   :  { %1886 = vpow2.f32 %v1291_v7  ;;  %v1462_v10 = vsub.f32 %v1455_v59, %v1461_v9 }
 0xaa1   :  { %v1463_v11 = vmul.f32 1.442695, %v1462_v10 }
 0xaa3   :  { %1888 = vpow2.f32 %v1463_v11 }
 0xaa4   :  { %v1883_v12 = vpop.eup %1882 }
 0xaa5   :  { %v955_v13 = vsel %vm264_vm3, %v1883_v12, 0.0 }
 0xaa6   :  { %956 = vadd.xlane.f32.xlu1 %v955_v13 }
 0xaa8   :  { %v1885_v14 = vpop.eup %1884 }
 0xaa9   :  { %v1120_v15 = vsel %vm264_vm3, %v1885_v14, 0.0 }
 0xaaa   :  { %1121 = vadd.xlane.f32.xlu0 %v1120_v15 }
 0xaac   :  { %v1887_v16 = vpop.eup %1886 }
 0xaad   :  { %v1293_v17 = vsel %vm264_vm3, %v1887_v16, 0.0 }
 0xaae   :  { %1294 = vadd.xlane.f32.xlu1 %v1293_v17 }
 0xab0   :  { %v1889_v18 = vpop.eup %1888 }
 0xab1   :  { %v1465_v19 = vsel %vm264_vm3, %v1889_v18, 0.0 }
 0xab2   :  { %1466 = vadd.xlane.f32.xlu0 %v1465_v19 }
 0xabf   :  { %1472 = vrot.lane.b32.xlu1 %v2085_v40, %s1927_s9 }
 0xac3   :  { %520 = vrot.lane.b32.xlu1 %v2129_v8, %s1928_s10 }
 0xac8   :  { %1300 = vrot.lane.b32.xlu0 %v2085_v40, %s1925_s29 }
 0xacc   :  { %693 = vrot.lane.b32.xlu0 %v2149_v24, %s1926_s30 }
 0xad0   :  { %866 = vrot.lane.b32.xlu0 %v861_v48, %s1922_s2 }
 0xb2f   :  { %v957_v21 = vpop.xlane.xlu1 %956 }
 0xb30   :  { %1890 = vrcp.f32 %v957_v21 }
 0xb33   :  { %v1122_v22 = vpop.xlane.xlu0 %1121 }
 0xb34   :  { %1892 = vrcp.f32 %v1122_v22 }
 0xb37   :  { %v1295_v23 = vpop.xlane.xlu1 %1294 }
 0xb38   :  { %1894 = vrcp.f32 %v1295_v23 }
 0xb3b   :  { %v1467_v26 = vpop.xlane.xlu0 %1466  ;;  %v1473_v28 = vpop.permute.xlu1 %1472 }
 0xb3c   :  { %1896 = vrcp.f32 %v1467_v26 }
 0xb3d   :  { %v1891_v29 = vpop.eup %1890 }
 0xb3e   :  { %v959_v8 = vmul.f32 %v1891_v29, %v1883_v12 }
 0xb3f   :  { %v1301_v30 = vpop.permute.xlu0 %1300  ;;  %v521_v40 = vpop.permute.xlu1 %520 }
 0xb40   :  { %524 = vst.msk [vmem:[#allocation2] sm:$0xff] %vm523_vm4, %v521_v40  ;;  %1803 = vmatmul.mubr.msk.f32.vlgmr.msra.gmra.mxu0 %vm264_vm3, %v959_v8 }
 0xb41   :  { %961 = vst.msk [vmem:[#allocation3 + $0x20] sm:$0xff] %vm264_vm3, %v959_v8  ;;  %v1893_v24 = vpop.eup %1892  ;;  %1811 = vmatpush3.msra.mxu0 %v1129_v20  ;;  %1812 = vmatprep.mubr.msk.f32.mxu0 %vm1921_vm1, %v1920_v4 }
 0xb42   :  { %1820 = vmatprep.subr.mxu0 %v1920_v4  ;;  %v1124_v32 = vmul.f32 %v1893_v24, %v1885_v14 }
 0xb43   :  { %v694_v33 = vpop.permute.xlu0 %693 }
 0xb44   :  { %697 = vst.msk [vmem:[#allocation2] sm:$0xff] %vm696_vm5, %v694_v33  ;;  %1813 = vmatmul.mubr.msk.f32.vlgmr.msra.gmra.mxu0 %vm264_vm3, %v1124_v32 }
 0xb45   :  { %1126 = vst.msk [vmem:[#allocation3 + $0x28] sm:$0xff] %vm264_vm3, %v1124_v32  ;;  %v1895_v34 = vpop.eup %1894  ;;  %1821 = vmatpush3.msra.mxu0 %v1301_v30  ;;  %1822 = vmatprep.mubr.msk.f32.mxu0 %vm1921_vm1, %v1920_v4 }
 0xb46   :  { %1830 = vmatprep.subr.mxu0 %v1920_v4  ;;  %v1297_v35 = vmul.f32 %v1895_v34, %v1887_v16 }
 0xb47   :  { %v867_v37 = vpop.permute.xlu0 %866 }
 0xb48   :  { %870 = vst.msk [vmem:[#allocation2] sm:$0xff] %vm869_vm6, %v867_v37  ;;  %1823 = vmatmul.mubr.msk.f32.vlgmr.msra.gmra.mxu0 %vm264_vm3, %v1297_v35 }
 0xb49   :  { %1299 = vst.msk [vmem:[#allocation3 + $0x30] sm:$0xff] %vm264_vm3, %v1297_v35  ;;  %v1897_v38 = vpop.eup %1896  ;;  %1831 = vmatpush3.msra.mxu0 %v1473_v28  ;;  %1832 = vmatprep.mubr.msk.f32.mxu0 %vm1921_vm1, %v1920_v4  ;;  %v1560_v4 = vld [vmem:[%s2278_s5 + $0x28] sm:$0xff]  ;;  %s1929_s5 = smov [#allocation3]  }
 0xb4a   :  { %v1469_v31 = vmul.f32 %v1897_v38, %v1889_v18  ;;  %1839 = vmatprep.subr.mxu1 %v1560_v4  ;;  %s1665_s1 = sshll.u32 %s1929_s5, 4  ;;  %s1666_s1 = int_to_ptr.vmem [resolvable:$true] %s1665_s1 }
 0xb4b   :  { %1840 = vmatpush3.msra.mxu1 %v1560_v4  ;;  %s1898_s25 = scalar_lea.vmem %s1666_s1, 1024  ;;  %p1903_p1 = scmp.lt.s32.totalorder %s1666_s1, %s1666_s1 }
 0xb4c   :  { %1471 = vst.msk [vmem:[#allocation3 + $0x38] sm:$0xff] %vm264_vm3, %v1469_v31  ;;  %1833 = vmatmul.mubr.msk.f32.vlgmr.msra.gmra.mxu0 %vm264_vm3, %v1469_v31  ;;  %1841 = vmatprep.subr.mxu1 %v1559_v39  ;;  %p1899_p0 = scmp.ne.s32.totalorder %s1666_s1, %s1898_s25  ;;  %p1904_p2 = scmp.lt.s32.totalorder %s1898_s25, %s1898_s25 }
 0xb4d   :  { %1842 = vmatpush3.msra.mxu1 %v1559_v39 }
 0xb4e   :  { %1843 = vmatprep.subr.mxu1 %v1558_v42  ;;  %p1905_p3 = por %p1904_p2, %p1903_p1 }
 0xb4f   :  { %v1553_v36 = vld [vmem:[#allocation2] sm:$0xff]  ;;  %1844 = vmatpush3.msra.mxu1 %v1558_v42 }
 0xb50   :  { %1851 = vmatprep.mubr.msk.f32.mxu1 %vm51_vm0, %v1553_v36  ;;  %1845 = vmatprep.subr.mxu1 %v1557_v43  ;;  %p1906_p4 = pnand %p1905_p3, %p1899_p0 }
 0xb51   :  { %1846 = vmatpush3.msra.mxu1 %v1557_v43 }
 0xb52   :  { %1847 = vmatprep.subr.mxu1 %v1556_v45 }
 0xb53   :  { %1848 = vmatpush3.msra.mxu1 %v1556_v45 }
 0xb54   :  { %1849 = vmatprep.subr.mxu1 %v1555_v47 }
 0xb55   :  { %1850 = vmatpush3.msra.mxu1 %v1555_v47 }
 0xc00   :  { %v1031_v41 = vpop.f32.mrf.mxu0 }
 0xc01   :  { %1035 = vst.msk [vmem:[#allocation2 + $0x8] sm:$0xff] %vm188_vm2, %v1031_v41 }
 0xc02   :  { %v1804_v44 = vpop.f32.mrf.mxu0 }
 0xc04   :  { %v1200_v46 = vpop.f32.mrf.mxu0 }
 0xc05   :  { %1205 = vrot.lane.b32.xlu1 %v1200_v46, %s1928_s10 }
 0xc06   :  { %v1814_v48 = vpop.f32.mrf.mxu0 }
 0xc08   :  { %v1372_v49 = vpop.f32.mrf.mxu0 }
 0xc09   :  { %1377 = vrot.lane.b32.xlu1 %v1372_v49, %s1926_s30 }
 0xc0a   :  { %v1824_v50 = vpop.f32.mrf.mxu0 }
 0xc0c   :  { %v1544_v51 = vpop.f32.mrf.mxu0 }
 0xc0d   :  { %1549 = vrot.lane.b32.xlu0 %v1544_v51, %s1922_s2 }
 0xc0e   :  { %v1834_v52 = vpop.f32.mrf.mxu0 }
 0xc77   :  { %v1206_v53 = vpop.permute.xlu1 %1205 }
 0xc78   :  { %1208 = vst.msk [vmem:[#allocation2 + $0x8] sm:$0xff] %vm523_vm4, %v1206_v53 }
 0xc7b   :  { %v1378_v54 = vpop.permute.xlu1 %1377 }
 0xc7c   :  { %1380 = vst.msk [vmem:[#allocation2 + $0x8] sm:$0xff] %vm696_vm5, %v1378_v54 }
 0xc7f   :  { %v1550_v55 = vpop.permute.xlu0 %1549 }
 0xc80   :  { %1552 = vst.msk [vmem:[#allocation2 + $0x8] sm:$0xff] %vm869_vm6, %v1550_v55 }
 0xc87   :  { %v1554_v56 = vld [vmem:[#allocation2 + $0x8] sm:$0xff] }
 0xc88   :  { %1852 = vmatmul.mubr.msk.f32.vlgmr.msra.gmra.mxu1 %vm51_vm0, %v1554_v56 }
 0xc89   :  { %1909 = shalt.err (!%p1906_p4)
}
 0xc8a   :  { %s1930_s2 = smov 128   ;;  %s1931_s27 = smov 8   ;;  %v1710_v57 = vld [vmem:[%s2279_s6] ss:$0 sm:$0xff]  ;;  %vm1656_vm7 = vcmask 1048064  }
 0xc8b   :  { %1671 = dma.vmem_to_hbm [thread:$0]  %s1666_s1, 1024, %s2281_s8, [#allocation4], %s1930_s2, %s1930_s2, %s1931_s27  }
 0xd48   :  { %v1853_v58 = vpop.f32.mrf.mxu1 }
 0xd49   :  { %v1648_v59 = vadd.f32 %v1853_v58, %v1710_v57 }
 0xd4a   :  { %v1642_v60 = vpop.f32.mrf.mxu1 }
 0xd4b   :  { %v1643_v61 = vadd.f32 %v1710_v57, %v1642_v60  ;;  %1653 = vrot.lane.b32.xlu1 %v1648_v59, %s1923_s26 }
 0xd4d   :  { %1651 = vst.msk [vmem:[%s2280_s7] sm:$0xff] %vm51_vm0, %v1643_v61 }
 0xdbd   :  { %v1654_v62 = vpop.permute.xlu1 %1653 }
 0xdbe   :  { %1657 = vst.msk [vmem:[%s2280_s7] sm:$0xff] %vm1656_vm7, %v1654_v62 }
 0xdbf   :  { %1918 = dma.done.wait [#allocation4], 1024  }
 0xdc0   :  { %1919 = vsyncadd [#allocation4], 4294966272 }
 0xdc1   :  { %1677 = vsyncpa [#allocation4], 1 }

</bundles_post_ra>
